<compile_context>
chip_gen: v7x
topology: tpu7x:2x2x1
jax: 0.10.0
libtpu: 0.0.40
codegen_flags: <defaults>
</compile_context>

<pallas_src>
import functools

import jax
import jax.numpy as jnp
from jax.experimental import pallas as pl
from jax.experimental.pallas import tpu as pltpu


def _triplet_kernel(a_ref, p_ref, n_ref, loss_ref, acc_ref, *,
                    margin, size_average, total_b, tb, use_mxu_reduce):
    i = pl.program_id(0)
    nsteps = pl.num_programs(0)

    # Init the per-row accumulator on the first grid step.
    @pl.when(i == 0)
    def _():
        acc_ref[...] = jnp.zeros_like(acc_ref)

    a = a_ref[...].astype(jnp.float32)
    p = p_ref[...].astype(jnp.float32)
    n = n_ref[...].astype(jnp.float32)

    dp = a - p
    dn = a - n
    # Fused: one lane reduction instead of two (sum(dp^2) - sum(dn^2) == sum(d)).
    d = dp * dp - dn * dn

    if use_mxu_reduce:
        # Large D: move the lane reduction onto the (otherwise idle) MXU.
        ones = jnp.ones((d.shape[1], 1), dtype=jnp.float32)
        per_row = jnp.dot(d, ones, preferred_element_type=jnp.float32)  # (TB, 1)
    else:
        per_row = jnp.sum(d, axis=1, keepdims=True)                      # (TB, 1)

    losses = jnp.maximum(per_row + margin, 0.0)  # F.relu(dp - dn + margin)

    # Mask padded tail rows when B is not a multiple of the batch tile.
    if total_b % tb != 0:
        row = jax.lax.broadcasted_iota(jnp.int32, (tb, 1), 0)
        valid = (i * tb + row) < total_b
        losses = jnp.where(valid, losses, 0.0)

    acc_ref[...] += losses

    # Finalize: reduce the resident per-row accumulator and write the scalar.
    @pl.when(i == nsteps - 1)
    def _():
        total = jnp.sum(acc_ref[...])
        if size_average:
            total = total / total_b     # divide by the FULL batch size
        loss_ref[0, 0] = total


def _pick_tb(b, d, itemsize, block_b=None):
    """Largest batch tile such that 3 inputs x 2 pipeline buffers fit in ~12 MiB."""
    if block_b is None:
        budget = 12 * 1024 * 1024
        tb = budget // (3 * 2 * d * itemsize)
        tb = int(max(8, min(tb, 1024)))
    else:
        tb = int(block_b)
    tb = max(8, (tb // 8) * 8)          # keep sublane-aligned (multiple of 8)
    if b <= tb:
        return b                        # single tile: block == full array dims
    return tb


def triplet_loss(anchor, positive, negative, margin, size_average=True,
                 block_b=None):
    """Pallas equivalent of TripletLoss(margin).forward(anchor, positive, negative)."""
    assert anchor.shape == positive.shape == negative.shape
    assert anchor.ndim == 2, "expected (batch, embedding_dim) embeddings"
    B, D = anchor.shape

    tb = _pick_tb(B, D, jnp.dtype(anchor.dtype).itemsize, block_b)
    grid = (pl.cdiv(B, tb),)

    kernel = functools.partial(
        _triplet_kernel,
        margin=float(margin),
        size_average=bool(size_average),
        total_b=int(B),
        tb=int(tb),
        use_mxu_reduce=(D >= 512),
    )

    out = pl.pallas_call(
        kernel,
        out_shape=jax.ShapeDtypeStruct((1, 1), jnp.float32),
        grid=grid,
        in_specs=[
            pl.BlockSpec((tb, D), lambda i: (i, 0)),
            pl.BlockSpec((tb, D), lambda i: (i, 0)),
            pl.BlockSpec((tb, D), lambda i: (i, 0)),
        ],
        out_specs=pl.BlockSpec((1, 1), lambda i: (0, 0),
                               memory_space=pltpu.MemorySpace.SMEM),
        scratch_shapes=[pltpu.VMEM((tb, 1), jnp.float32)],
        compiler_params=pltpu.CompilerParams(
            dimension_semantics=("arbitrary",),     # reduction axis, accumulator
            vmem_limit_bytes=32 * 1024 * 1024,      # raise v5e's 16 MiB default
        ),
    )(anchor, positive, negative)
    return out[0, 0]


def _reference(anchor, positive, negative, margin, size_average=True):
    dp = jnp.sum((anchor - positive) ** 2, axis=1)
    dn = jnp.sum((anchor - negative) ** 2, axis=1)
    losses = jnp.maximum(dp - dn + margin, 0.0)
    return jnp.mean(losses) if size_average else jnp.sum(losses)


if __name__ == "__main__":
    key = jax.random.PRNGKey(0)
    margin = 1.0

    # Case 1: tiny shipped-style config (single tile).
    B, D = 8, 32
    k_a, k_p, k_n = jax.random.split(key, 3)
    anchor = jax.random.normal(k_a, (B, D), dtype=jnp.float32)
    positive = jax.random.normal(k_p, (B, D), dtype=jnp.float32)
    negative = jax.random.normal(k_n, (B, D), dtype=jnp.float32)

    loss = triplet_loss(anchor, positive, negative, margin, size_average=True)
    jax.block_until_ready(loss)
    ref = _reference(anchor, positive, negative, margin, size_average=True)
    assert jnp.allclose(loss, ref, rtol=1e-5, atol=1e-5), (loss, ref)

    # Case 2: exercise the multi-tile pipelined path with a ragged last tile
    # (B=20, TB=8 -> 3 grid steps, tail masking, mean divides by full B).
    B2, D2 = 20, 32
    k_a2, k_p2, k_n2 = jax.random.split(jax.random.PRNGKey(1), 3)
    a2 = jax.random.normal(k_a2, (B2, D2), dtype=jnp.float32)
    p2 = jax.random.normal(k_p2, (B2, D2), dtype=jnp.float32)
    n2 = jax.random.normal(k_n2, (B2, D2), dtype=jnp.float32)

    loss2 = triplet_loss(a2, p2, n2, margin, size_average=True, block_b=8)
    jax.block_until_ready(loss2)
    ref2 = _reference(a2, p2, n2, margin, size_average=True)
    assert jnp.allclose(loss2, ref2, rtol=1e-5, atol=1e-5), (loss2, ref2)

    # Case 3: size_average=False (sum reduction) on the tiled path.
    loss3 = triplet_loss(a2, p2, n2, margin, size_average=False, block_b=8)
    jax.block_until_ready(loss3)
    ref3 = _reference(a2, p2, n2, margin, size_average=False)
    assert jnp.allclose(loss3, ref3, rtol=1e-5, atol=1e-5), (loss3, ref3)

    print("KERNEL_OK")
</pallas_src>

<mosaic_0001>
module attributes {stable_mosaic.version = 11 : i64} {
  func.func @_triplet_kernel(%arg0: i32, %arg1: memref<8x32xf32, #tpu.memory_space<vmem>>, %arg2: memref<8x32xf32, #tpu.memory_space<vmem>>, %arg3: memref<8x32xf32, #tpu.memory_space<vmem>>, %arg4: memref<1x1xf32, #tpu.memory_space<smem>>, %arg5: memref<8x1xf32, #tpu.memory_space<vmem>>) attributes {dimension_semantics = [#tpu.dimension_semantics<arbitrary>], iteration_bounds = array<i64: 1>, scalar_prefetch = 0 : i64, scratch_operands = 1 : i64, tpu.core_type = #tpu.core_type<tc>, window_params = [{transform_indices = @transform_0, window_bounds = array<i64: 8, 32>}, {transform_indices = @transform_1, window_bounds = array<i64: 8, 32>}, {transform_indices = @transform_2, window_bounds = array<i64: 8, 32>}, {transform_indices = @transform_3, window_bounds = array<i64: 1, 1>}]} {
    %c0_i32 = arith.constant 0 : i32
    %0 = arith.cmpi eq, %arg0, %c0_i32 : i32
    %1 = arith.extui %0 : i1 to i32
    %c0_i32_0 = arith.constant 0 : i32
    %2 = arith.cmpi ne, %1, %c0_i32_0 : i32
    scf.if %2 {
      %cst_14 = arith.constant 0.000000e+00 : f32
      %23 = vector.broadcast %cst_14 : f32 to vector<8x1xf32>
      %c0_15 = arith.constant 0 : index
      %c0_16 = arith.constant 0 : index
      %24 = vector.load %arg5[%c0_15, %c0_16] : memref<8x1xf32, #tpu.memory_space<vmem>>, vector<8x1xf32>
      tpu.vector_store %arg5[%c0_15, %c0_16], %23 {strides = array<i32>} : memref<8x1xf32, #tpu.memory_space<vmem>>, vector<8x1xf32>,
    } else {
    }
    %c0 = arith.constant 0 : index
    %c0_1 = arith.constant 0 : index
    %3 = vector.load %arg1[%c0, %c0_1] : memref<8x32xf32, #tpu.memory_space<vmem>>, vector<8x32xf32>
    %c0_2 = arith.constant 0 : index
    %c0_3 = arith.constant 0 : index
    %4 = vector.load %arg2[%c0_2, %c0_3] : memref<8x32xf32, #tpu.memory_space<vmem>>, vector<8x32xf32>
    %c0_4 = arith.constant 0 : index
    %c0_5 = arith.constant 0 : index
    %5 = vector.load %arg3[%c0_4, %c0_5] : memref<8x32xf32, #tpu.memory_space<vmem>>, vector<8x32xf32>
    %6 = arith.subf %3, %4 : vector<8x32xf32>
    %7 = arith.subf %3, %5 : vector<8x32xf32>
    %8 = arith.mulf %6, %6 : vector<8x32xf32>
    %9 = arith.mulf %7, %7 : vector<8x32xf32>
    %10 = arith.subf %8, %9 : vector<8x32xf32>
    %cst = arith.constant dense<0.000000e+00> : vector<8xf32>
    %11 = vector.multi_reduction <add>, %10, %cst [1] : vector<8x32xf32> to vector<8xf32>
    %12 = vector.shape_cast %11 : vector<8xf32> to vector<8x1xf32>
    %cst_6 = arith.constant 1.000000e+00 : f32
    %13 = vector.broadcast %cst_6 : f32 to vector<8x1xf32>
    %14 = arith.addf %12, %13 : vector<8x1xf32>
    %cst_7 = arith.constant 0.000000e+00 : f32
    %15 = vector.broadcast %cst_7 : f32 to vector<8x1xf32>
    %16 = arith.maximumf %14, %15 : vector<8x1xf32>
    %c0_8 = arith.constant 0 : index
    %c0_9 = arith.constant 0 : index
    %17 = vector.load %arg5[%c0_8, %c0_9] : memref<8x1xf32, #tpu.memory_space<vmem>>, vector<8x1xf32>
    %18 = arith.addf %17, %16 : vector<8x1xf32>
    %c0_10 = arith.constant 0 : index
    %c0_11 = arith.constant 0 : index
    %19 = vector.load %arg5[%c0_10, %c0_11] : memref<8x1xf32, #tpu.memory_space<vmem>>, vector<8x1xf32>
    tpu.vector_store %arg5[%c0_10, %c0_11], %18 {strides = array<i32>} : memref<8x1xf32, #tpu.memory_space<vmem>>, vector<8x1xf32>,
    %c0_i32_12 = arith.constant 0 : i32
    %20 = arith.cmpi eq, %arg0, %c0_i32_12 : i32
    %21 = arith.extui %20 : i1 to i32
    %c0_i32_13 = arith.constant 0 : i32
    %22 = arith.cmpi ne, %21, %c0_i32_13 : i32
    scf.if %22 {
      %c0_14 = arith.constant 0 : index
      %c0_15 = arith.constant 0 : index
      %23 = vector.load %arg5[%c0_14, %c0_15] : memref<8x1xf32, #tpu.memory_space<vmem>>, vector<8x1xf32>
      %24 = vector.shape_cast %23 : vector<8x1xf32> to vector<1x8x1xf32>
      %cst_16 = arith.constant dense<0.000000e+00> : vector<1xf32>
      %25 = vector.multi_reduction <add>, %24, %cst_16 [1, 2] : vector<1x8x1xf32> to vector<1xf32>
      %26 = vector.shape_cast %25 : vector<1xf32> to vector<1x1x1xf32>
      %27 = vector.extract %26[0, 0, 0] : f32 from vector<1x1x1xf32>
      %cst_17 = arith.constant 8.000000e+00 : f32
      %28 = arith.divf %27, %cst_17 : f32
      %c0_18 = arith.constant 0 : index
      %c0_19 = arith.constant 0 : index
      %29 = memref.load %arg4[%c0_18, %c0_19] : memref<1x1xf32, #tpu.memory_space<smem>>
      memref.store %28, %arg4[%c0_18, %c0_19] : memref<1x1xf32, #tpu.memory_space<smem>>
    } else {
    }
    return
  }
  func.func @transform_0(%arg0: i32) -> (i32, i32) {
    %c0_i32 = arith.constant 0 : i32
    %c0_i32_0 = arith.constant 0 : i32
    return %arg0, %c0_i32 : i32, i32
  }
  func.func @transform_1(%arg0: i32) -> (i32, i32) {
    %c0_i32 = arith.constant 0 : i32
    %c0_i32_0 = arith.constant 0 : i32
    return %arg0, %c0_i32 : i32, i32
  }
  func.func @transform_2(%arg0: i32) -> (i32, i32) {
    %c0_i32 = arith.constant 0 : i32
    %c0_i32_0 = arith.constant 0 : i32
    return %arg0, %c0_i32 : i32, i32
  }
  func.func @transform_3(%arg0: i32) -> (i32, i32) {
    %c0_i32 = arith.constant 0 : i32
    %c0_i32_0 = arith.constant 0 : i32
    %c0_i32_1 = arith.constant 0 : i32
    return %c0_i32, %c0_i32_0 : i32, i32
  }
}

</mosaic_0001>

<bundles_post_ra>
// kernel: tpu_custom_call.1
= control target key start
LH: loop header
LB: loop body
LE: loop exit
PB: predicated region body
PF: predicated region fallthrough
CT: control target
= control target key end

     0   :  { %8 = vsyncpa [#allocation4], 0  ;;  %s270_s0 = inlined_call_operand.hbm [shape: f32[8,32], index: 0, kind: input, shape index: {}]   ;;  %s271_s1 = inlined_call_operand.hbm [shape: f32[8,32], index: 1, kind: input, shape index: {}]   ;;  %s272_s2 = inlined_call_operand.hbm [shape: f32[8,32], index: 2, kind: input, shape index: {}]   ;;  %s273_s3 = inlined_call_operand.hbm [shape: f32[1,1], index: 3, kind: output, shape index: {}]  }
   0x1   :  { %9 = vsyncpa [#allocation7], 0 }
   0x2   :  { %10 = vsyncpa [#allocation5], 0  ;;  %s197_s12 = smov [#allocation6]   ;;  %s198_s14 = smov [#allocation3]  }
   0x3   :  { %s27_s13 = sshll.u32 %s197_s12, 4  ;;  %s17_s15 = sshll.u32 %s198_s14, 4  ;;  %s28_s13 = int_to_ptr.vmem [resolvable:$true] %s27_s13  ;;  %s18_s15 = int_to_ptr.vmem [resolvable:$true] %s17_s15 }
   0x4   :  { %s115_s18 = scalar_lea.hbm %s271_s1, 128 }
   0x5   :  { %p116_p0 = scmp.ne.s32.totalorder %s271_s1, %s115_s18  ;;  %p119_p1 = scmp.lt.u32.totalorder %s115_s18, %s271_s1 }
   0x7   :  { %p121_p2 = pnand %p119_p1, %p116_p0 }
   0x9   :  { %124 = shalt.err (!%p121_p2)
}
   0xa   :  { %s125_s23 = scalar_lea.vmem %s28_s13, 128  ;;  %p130_p4 = scmp.lt.s32.totalorder %s28_s13, %s28_s13 }
   0xb   :  { %p126_p3 = scmp.ne.s32.totalorder %s28_s13, %s125_s23  ;;  %p131_p5 = scmp.lt.s32.totalorder %s125_s23, %s125_s23 }
   0xd   :  { %p132_p6 = por %p131_p5, %p130_p4 }
   0xf   :  { %p133_p7 = pnand %p132_p6, %p126_p3 }
  0x11   :  { %136 = shalt.err (!%p133_p7)
}
  0x12   :  { %30 = dma.hbm_to_vmem [thread:$0]  %s271_s1, 128, %s28_s13, [#allocation7]  }
  0x13   :  { %s137_s28 = scalar_lea.hbm %s270_s0, 128 }
  0x14   :  { %p138_p8 = scmp.ne.s32.totalorder %s270_s0, %s137_s28  ;;  %p141_p9 = scmp.lt.u32.totalorder %s137_s28, %s270_s0 }
  0x16   :  { %p143_p10 = pnand %p141_p9, %p138_p8 }
  0x18   :  { %146 = shalt.err (!%p143_p10)
}
  0x19   :  { %s147_s6 = scalar_lea.vmem %s18_s15, 128  ;;  %p152_p12 = scmp.lt.s32.totalorder %s18_s15, %s18_s15 }
  0x1a   :  { %p148_p11 = scmp.ne.s32.totalorder %s18_s15, %s147_s6  ;;  %p153_p13 = scmp.lt.s32.totalorder %s147_s6, %s147_s6 }
  0x1c   :  { %p154_p0 = por %p153_p13, %p152_p12 }
  0x1e   :  { %p155_p1 = pnand %p154_p0, %p148_p11 }
  0x20   :  { %158 = shalt.err (!%p155_p1)
}
  0x21   :  { %20 = dma.hbm_to_vmem [thread:$0]  %s270_s0, 128, %s18_s15, [#allocation4]  }
  0x22   :  { %s199_s8 = smov [#allocation8]   ;;  %s159_s12 = scalar_lea.hbm %s272_s2, 128 }
  0x23   :  { %s37_s9 = sshll.u32 %s199_s8, 4  ;;  %p160_p2 = scmp.ne.s32.totalorder %s272_s2, %s159_s12  ;;  %s38_s9 = int_to_ptr.vmem [resolvable:$true] %s37_s9 }
  0x24   :  { %p163_p3 = scmp.lt.u32.totalorder %s159_s12, %s272_s2 }
  0x26   :  { %p165_p4 = pnand %p163_p3, %p160_p2 }
  0x28   :  { %168 = shalt.err (!%p165_p4)
}
  0x29   :  { %s169_s18 = scalar_lea.vmem %s38_s9, 128  ;;  %p174_p6 = scmp.lt.s32.totalorder %s38_s9, %s38_s9 }
  0x2a   :  { %p170_p5 = scmp.ne.s32.totalorder %s38_s9, %s169_s18  ;;  %p175_p7 = scmp.lt.s32.totalorder %s169_s18, %s169_s18 }
  0x2c   :  { %p176_p8 = por %p175_p7, %p174_p6 }
  0x2e   :  { %p177_p9 = pnand %p176_p8, %p170_p5 }
  0x30   :  { %180 = shalt.err (!%p177_p9)
}
  0x31   :  { %40 = dma.hbm_to_vmem [thread:$0]  %s272_s2, 128, %s38_s9, [#allocation7]  }
  0x32   :  { %191 = dma.done.wait [#allocation4], 128  }
  0x33   :  { %192 = vsyncadd [#allocation4], 4294967168 }
  0x34   :  { %193 = dma.done.wait [#allocation7], 256  }
  0x35   :  { %194 = vsyncadd [#allocation7], 4294967040  ;;  %v56_v0 = vld [vmem:[#allocation3] sm:$0xff]  ;;  %v57_v1 = vld [vmem:[#allocation6] sm:$0xff]  ;;  %vm64_vm0 = vcmask 261120   ;;  %vm54_vm1 = vcmask 7168  }
  0x36   :  { %v58_v2 = vld [vmem:[#allocation8] sm:$0xff]  ;;  %v59_v3 = vsub.f32 %v56_v0, %v57_v1  ;;  %v200_v9 = vmov 0.0   ;;  %s181_s22 = scalar_lea.hbm %s273_s3, 16 }
  0x37   :  { %v60_v4 = vsub.f32 %v56_v0, %v58_v2  ;;  %55 = vst.msk [vmem:[#allocation2] sm:$0xff] %vm54_vm1, %v200_v9  ;;  %p182_p10 = scmp.ne.s32.totalorder %s273_s3, %s181_s22  ;;  %p185_p11 = scmp.lt.u32.totalorder %s181_s22, %s273_s3 }
  0x38   :  { %v61_v5 = vmul.f32 %v59_v3, %v59_v3 }
  0x39   :  { %v62_v6 = vmul.f32 %v60_v4, %v60_v4  ;;  %p187_p12 = pnand %p185_p11, %p182_p10 }
  0x3b   :  { %v63_v7 = vsub.f32 %v61_v5, %v62_v6 }
  0x3d   :  { %v65_v8 = vsel %vm64_vm0, %v63_v7, 0.0 }
  0x3e   :  { %66 = vadd.xlane.f32.xlu0 %v65_v8  ;;  %v70_v12 = vld [vmem:[#allocation2] sm:$0xff] }
  0xcb   :  { %v67_v10 = vpop.xlane.xlu0 %66 }
  0xcc   :  { %v68_v11 = vadd.f32 1.0, %v67_v10 }
  0xce   :  { %v69_v13 = vmax.f32 %v68_v11, 0.0 }
  0xd0   :  { %v71_v14 = vadd.f32 %v70_v12, %v69_v13 }
  0xd2   :  { %73 = vst.msk [vmem:[#allocation2] sm:$0xff] %vm54_vm1, %v71_v14 }
  0xd9   :  { %v77_v15 = vld [vmem:[#allocation2] sm:$0xff] }
  0xda   :  { %v78_v16 = vsel %vm54_vm1, %v77_v15, 0.0 }
  0xdb   :  { %79 = vadd.xlane.f32.xlu0 %v78_v16 }
 0x168   :  { %v80_v17 = vpop.xlane.xlu0 %79 }
 0x169   :  { %v81_v18 = vrot.slane %v80_v17, 4 }
 0x16b   :  { %v82_v19 = vadd.f32 %v81_v18, %v80_v17 }
 0x16d   :  { %v83_v20 = vrot.slane %v82_v19, 2 }
 0x16f   :  { %v84_v21 = vadd.f32 %v83_v20, %v82_v19 }
 0x171   :  { %v85_v22 = vrot.slane %v84_v21, 1 }
 0x173   :  { %v86_v23 = vadd.f32 %v85_v22, %v84_v21 }
 0x175   :  { %108 = vpush %v86_v23 }
 0x1a6   :  { %s109_s2 = spop %108 }
 0x1a7   :  { %s90_s19 = smul.f32 0.125, %s109_s2 }
 0x1a9   :  { %92 = sst [smem:[#allocation9]] %s90_s19 }
 0x1aa   :  { %190 = shalt.err (!%p187_p12)
}
 0x1ab   :  { %s201_s27 = smov [#allocation9]  }
 0x1ac   :  { %100 = dma.smem_to_hbm %s201_s27, 16, %s273_s3, [#allocation5]  }
 0x1ad   :  { %195 = dma.done.wait [#allocation5], 16  }
 0x1ae   :  { %196 = vsyncadd [#allocation5], 4294967280 }
 0x1af   :  { %104 = sfence }
 0x1b0   :  { %105 = vsyncpa [#allocation4], 1 }
 0x1b1   :  { %106 = vsyncpa [#allocation7], 1 }
 0x1b2   :  { %107 = vsyncpa [#allocation5], 1 }

</bundles_post_ra>
